<compile_context>
chip_gen: v7x
topology: tpu7x:2x2x1
jax: 0.10.0
libtpu: 0.0.40
codegen_flags: <defaults>
</compile_context>

<pallas_src>
import jax
import jax.numpy as jnp
from jax.experimental import pallas as pl
from jax.experimental.pallas import tpu as pltpu


def _scaler_kernel(fs_ref, scale_ref, out_ref):
    # fs_ref: (1, 1) f32 in SMEM (runtime scalar, no recompile per value).
    # scale_ref / out_ref: (1, dim) full-array blocks resident in VMEM.
    out_ref[...] = scale_ref[...] * fs_ref[0, 0]


def scaler_forward(scale_param_2d: jax.Array, forward_scale: jax.Array) -> jax.Array:
    """Pallas equivalent of Scaler.forward(): scale_param * forward_scale.

    scale_param_2d: (1, dim) parameter (laid out once at init time).
    forward_scale:  scalar array (init / scale).
    Returns (1, dim); caller reshapes to (dim,) if needed (metadata-only).
    """
    fs = jnp.asarray(forward_scale, dtype=scale_param_2d.dtype).reshape(1, 1)
    return pl.pallas_call(
        _scaler_kernel,
        out_shape=jax.ShapeDtypeStruct(scale_param_2d.shape, scale_param_2d.dtype),
        # No grid: one whole-array block, no pipelining machinery.
        in_specs=[
            pl.BlockSpec(memory_space=pltpu.MemorySpace.SMEM),   # forward_scale
            pl.BlockSpec(memory_space=pltpu.MemorySpace.VMEM),   # scale param
        ],
        out_specs=pl.BlockSpec(memory_space=pltpu.MemorySpace.VMEM),
        # NOTE: input_output_aliases={1: 0} would halve HBM traffic but
        # overwrites the parameter; only valid under donation semantics.
    )(fs, scale_param_2d)


class ScalerJAX:
    """Deterministic re-implementation of the PyTorch Scaler module."""

    def __init__(self, dim: int, init: float, scale: float):
        self.dim = dim
        # nn.Parameter(torch.ones(dim) * scale), stored (1, dim) at init time
        # so the per-call path has zero layout plumbing.
        self.scale = jnp.full((1, dim), scale, dtype=jnp.float32)
        # Runtime scalar (not a compile-time immediate): changing init/scale
        # does not force a Mosaic recompile.
        self.forward_scale = jnp.float32(init / scale)

    def __call__(self) -> jax.Array:
        out2d = scaler_forward(self.scale, self.forward_scale)
        return out2d.reshape(self.dim)


if __name__ == "__main__":
    dim = 32
    init_val = 1.0
    scale_val = 1.0 / (dim ** 0.5)

    mod = ScalerJAX(dim, init_val, scale_val)

    # Perturb the parameter deterministically so the multiply is non-trivial
    # (as if it had been trained), using PRNGKey(0).
    key = jax.random.PRNGKey(0)
    mod.scale = mod.scale + 0.01 * jax.random.normal(key, (1, dim), dtype=jnp.float32)

    out = mod()
    out = jax.block_until_ready(out)

    # Reference check in plain JAX.
    ref = (mod.scale * mod.forward_scale).reshape(dim)
    assert out.shape == (dim,)
    assert out.dtype == mod.scale.dtype
    assert jnp.allclose(out, ref, atol=1e-6, rtol=1e-6)

    print("KERNEL_OK")
</pallas_src>

<mosaic_0001>
module attributes {stable_mosaic.version = 11 : i64} {
  func.func @_scaler_kernel(%arg0: memref<1x1xf32, #tpu.memory_space<smem>>, %arg1: memref<1x32xf32, #tpu.memory_space<vmem>>, %arg2: memref<1x32xf32, #tpu.memory_space<vmem>>) attributes {dimension_semantics = [], scalar_prefetch = 0 : i64, scratch_operands = 0 : i64, tpu.core_type = #tpu.core_type<tc>} {
    %c0 = arith.constant 0 : index
    %c0_0 = arith.constant 0 : index
    %0 = vector.load %arg1[%c0, %c0_0] : memref<1x32xf32, #tpu.memory_space<vmem>>, vector<1x32xf32>
    %c0_1 = arith.constant 0 : index
    %c0_2 = arith.constant 0 : index
    %1 = memref.load %arg0[%c0_1, %c0_2] : memref<1x1xf32, #tpu.memory_space<smem>>
    %2 = vector.broadcast %1 : f32 to vector<1x32xf32>
    %3 = arith.mulf %0, %2 : vector<1x32xf32>
    %c0_3 = arith.constant 0 : index
    %c0_4 = arith.constant 0 : index
    %4 = vector.load %arg2[%c0_3, %c0_4] : memref<1x32xf32, #tpu.memory_space<vmem>>, vector<1x32xf32>
    tpu.vector_store %arg2[%c0_3, %c0_4], %3 {strides = array<i32>} : memref<1x32xf32, #tpu.memory_space<vmem>>, vector<1x32xf32>,
    return
  }
}

</mosaic_0001>

<bundles_post_ra>
// kernel: tpu_custom_call.1
= control target key start
LH: loop header
LB: loop body
LE: loop exit
PB: predicated region body
PF: predicated region fallthrough
CT: control target
= control target key end

     0   :  { %vm17_vm0 = vcmask 253952   ;;  %s92_s0 = inlined_call_operand.<no memory space> [shape: f32[1,1], index: 0, kind: input, shape index: {}]   ;;  %s93_s1 = inlined_call_operand.vmem [shape: f32[1,32], index: 1, kind: input, shape index: {}]   ;;  %s94_s2 = inlined_call_operand.hbm [shape: f32[1,32], index: 2, kind: output, shape index: {}]  }
   0x1   :  { %v13_v0 = vld [vmem:[%s93_s1] sm:$0x1]  ;;  %v15_v1 = vstv %s92_s0 }
   0x2   :  { %8 = vsyncpa [#allocation4], 0  ;;  %v16_v2 = vmul.f32 %v15_v1, %v13_v0  ;;  %s58_s13 = smov [#allocation3]  }
   0x3   :  { %s25_s14 = sshll.u32 %s58_s13, 4  ;;  %s26_s14 = int_to_ptr.vmem [resolvable:$true] %s25_s14 }
   0x4   :  { %18 = vst.msk [vmem:[#allocation3] sm:$0x1] %vm17_vm0, %v16_v2  ;;  %s34_s15 = scalar_lea.vmem %s26_s14, 16  ;;  %s38_s16 = scalar_lea.vmem %s26_s14, 32 }
   0x5   :  { %p35_p0 = scmp.ne.s32.totalorder %s26_s14, %s34_s15  ;;  %p39_p1 = scmp.lt.s32.totalorder %s26_s14, %s26_s14 }
   0x6   :  { %p40_p2 = scmp.lt.s32.totalorder %s38_s16, %s34_s15 }
   0x8   :  { %p41_p3 = por %p40_p2, %p39_p1 }
   0xa   :  { %p42_p4 = pnand %p41_p3, %p35_p0 }
   0xc   :  { %45 = shalt.err (!%p42_p4)
}
   0xd   :  { %s46_s18 = scalar_lea.hbm %s94_s2, 16 }
   0xe   :  { %p47_p5 = scmp.ne.s32.totalorder %s94_s2, %s46_s18  ;;  %p50_p6 = scmp.lt.u32.totalorder %s46_s18, %s94_s2 }
  0x10   :  { %p52_p7 = pnand %p50_p6, %p47_p5 }
  0x12   :  { %55 = shalt.err (!%p52_p7)
}
  0x13   :  { %28 = dma.vmem_to_hbm [thread:$0]  %s26_s14, 16, %s94_s2, [#allocation4]  }
  0x14   :  { %56 = dma.done.wait [#allocation4], 16  }
  0x15   :  { %57 = vsyncadd [#allocation4], 4294967280 }
  0x16   :  { %32 = vsyncpa [#allocation4], 1 }

</bundles_post_ra>
